<compile_context>
chip_gen: v6e
topology: v6e:2x2x1
jax: 0.10.0
libtpu: 0.0.40
codegen_flags: <defaults>
</compile_context>

<pallas_src>
import functools

import jax
import jax.numpy as jnp
from jax.experimental import pallas as pl
from jax.experimental.pallas import tpu as pltpu


def _round_up(n, m):
    return (n + m - 1) // m * m


def _mlp_kernel(x_ref, w1_ref, b1_ref, w2_ref, b2_ref, w3_ref, b3_ref,
                w4_ref, b4_ref, out_ref, *, reduce_out=False):
    """BaseMLP forward for one batch tile; all weights resident in VMEM."""
    wdt = w1_ref.dtype

    h = jnp.dot(x_ref[...].astype(wdt), w1_ref[...],
                preferred_element_type=jnp.float32) + b1_ref[...]
    h = jnp.maximum(h, 0.0)

    h = jnp.dot(h.astype(wdt), w2_ref[...],
                preferred_element_type=jnp.float32) + b2_ref[...]
    h = jnp.maximum(h, 0.0)

    h = jnp.dot(h.astype(wdt), w3_ref[...],
                preferred_element_type=jnp.float32) + b3_ref[...]
    h = jnp.maximum(h, 0.0)

    if reduce_out:
        # out_size == 1: VPU multiply + lane reduction instead of a padded
        # N=1 MXU push (frees the MXU slot, removes one drain).
        w4_row = w4_ref[...].T.astype(jnp.float32)          # [1, H]
        y = jnp.sum(h * w4_row, axis=-1, keepdims=True) + b4_ref[...]
    else:
        y = jnp.dot(h.astype(wdt), w4_ref[...],
                    preferred_element_type=jnp.float32) + b4_ref[...]

    out_ref[...] = y.astype(out_ref.dtype)


def prepare_params(params, weights_dtype=jnp.float32):
    """One-time parameter prep (do NOT call per forward).

    Transposes PyTorch-convention [out, in] weights to [in, out] and reshapes
    biases to [1, out]. Optionally casts weights to bf16 (v6e/v7x); biases /
    accumulation stay f32.
    """
    return dict(
        w1=params["w1"].T.astype(weights_dtype),
        b1=params["b1"].reshape(1, -1).astype(jnp.float32),
        w2=params["w2"].T.astype(weights_dtype),
        b2=params["b2"].reshape(1, -1).astype(jnp.float32),
        w3=params["w3"].T.astype(weights_dtype),
        b3=params["b3"].reshape(1, -1).astype(jnp.float32),
        w4=params["w4"].T.astype(weights_dtype),
        b4=params["b4"].reshape(1, -1).astype(jnp.float32),
    )


def base_mlp_forward(x, prep, *, block_b=512):
    """JAX wrapper. x: [B, in_size] -> [B, out_size]."""
    B, in_size = x.shape
    w1, b1 = prep["w1"], prep["b1"]
    w2, b2 = prep["w2"], prep["b2"]
    w3, b3 = prep["w3"], prep["b3"]
    w4, b4 = prep["w4"], prep["b4"]
    hidden = w1.shape[1]
    out_size = w4.shape[1]
    reduce_out = (out_size == 1)

    # Batch tiling: TB rows per grid step, padded so TB | B_pad and TB % 8 == 0
    # (or TB == full padded batch for small B).
    tb = min(block_b, _round_up(B, 8))
    b_pad = _round_up(B, tb)
    if b_pad != B:
        x = jnp.pad(x, ((0, b_pad - B), (0, 0)))
    grid = (b_pad // tb,)

    weights = (w1, b1, w2, b2, w3, b3, w4, b4)

    # Real VMEM footprint: resident weights + double-buffered in/out tiles +
    # in-flight intermediates + headroom; cap well under v7x's 64 MiB.
    weight_bytes = sum(int(a.size) * a.dtype.itemsize for a in weights)
    max_d = max(in_size, hidden, out_size)
    vmem_limit = int(min(48 << 20,
                         max(16 << 20,
                             weight_bytes + 8 * tb * max_d * 4 + (4 << 20))))

    def const_spec(a):
        return pl.BlockSpec(a.shape, lambda i: (0,) * a.ndim)

    out = pl.pallas_call(
        functools.partial(_mlp_kernel, reduce_out=reduce_out),
        out_shape=jax.ShapeDtypeStruct((b_pad, out_size), jnp.float32),
        grid=grid,
        in_specs=[pl.BlockSpec((tb, in_size), lambda i: (i, 0))]
                 + [const_spec(a) for a in weights],
        out_specs=pl.BlockSpec((tb, out_size), lambda i: (i, 0)),
        compiler_params=pltpu.CompilerParams(
            dimension_semantics=("parallel",),
            vmem_limit_bytes=vmem_limit),
    )(x, *weights)
    return out[:B]


def init_params(key, in_size, out_size, hidden):
    """Deterministic synthetic init (PyTorch Linear shape convention: [out, in])."""
    ks = jax.random.split(key, 8)

    def lin(kw, kb, out_d, in_d):
        bound = 1.0 / jnp.sqrt(in_d)
        w = jax.random.uniform(kw, (out_d, in_d), jnp.float32, -bound, bound)
        b = jax.random.uniform(kb, (out_d,), jnp.float32, -bound, bound)
        return w, b

    w1, b1 = lin(ks[0], ks[1], hidden, in_size)
    w2, b2 = lin(ks[2], ks[3], hidden, hidden)
    w3, b3 = lin(ks[4], ks[5], hidden, hidden)
    w4, b4 = lin(ks[6], ks[7], out_size, hidden)
    return dict(w1=w1, b1=b1, w2=w2, b2=b2, w3=w3, b3=b3, w4=w4, b4=b4)


def base_mlp_ref(x, p):
    """Pure-JAX reference matching the PyTorch BaseMLP.forward exactly."""
    h = jax.nn.relu(x @ p["w1"].T + p["b1"])
    h = jax.nn.relu(h @ p["w2"].T + p["b2"])
    h = jax.nn.relu(h @ p["w3"].T + p["b3"])
    return h @ p["w4"].T + p["b4"]


if __name__ == "__main__":
    B, IN_SIZE, HIDDEN, OUT_SIZE = 8, 16, 32, 4

    key = jax.random.PRNGKey(0)
    k_x, k_p = jax.random.split(key)
    x = jax.random.normal(k_x, (B, IN_SIZE), jnp.float32)
    params = init_params(k_p, IN_SIZE, OUT_SIZE, HIDDEN)

    prep = prepare_params(params)          # one-time weight prep (perf feedback)

    out = jax.block_until_ready(base_mlp_forward(x, prep))
    ref = jax.block_until_ready(base_mlp_ref(x, params))

    assert out.shape == (B, OUT_SIZE), out.shape
    assert jnp.allclose(out, ref, atol=1e-5, rtol=1e-5), (out, ref)
    print("KERNEL_OK")
</pallas_src>

<mosaic_0001>
module attributes {stable_mosaic.version = 11 : i64} {
  func.func @_mlp_kernel(%arg0: i32, %arg1: memref<8x16xf32, #tpu.memory_space<vmem>>, %arg2: memref<16x32xf32, #tpu.memory_space<vmem>>, %arg3: memref<1x32xf32, #tpu.memory_space<vmem>>, %arg4: memref<32x32xf32, #tpu.memory_space<vmem>>, %arg5: memref<1x32xf32, #tpu.memory_space<vmem>>, %arg6: memref<32x32xf32, #tpu.memory_space<vmem>>, %arg7: memref<1x32xf32, #tpu.memory_space<vmem>>, %arg8: memref<32x4xf32, #tpu.memory_space<vmem>>, %arg9: memref<1x4xf32, #tpu.memory_space<vmem>>, %arg10: memref<8x4xf32, #tpu.memory_space<vmem>>) attributes {dimension_semantics = [#tpu.dimension_semantics<parallel>], iteration_bounds = array<i64: 1>, scalar_prefetch = 0 : i64, scratch_operands = 0 : i64, tpu.core_type = #tpu.core_type<tc>, window_params = [{transform_indices = @transform_0, window_bounds = array<i64: 8, 16>}, {pipeline_mode = #tpu.pipeline_mode<synchronous>, transform_indices = @transform_1, window_bounds = array<i64: 16, 32>}, {pipeline_mode = #tpu.pipeline_mode<synchronous>, transform_indices = @transform_2, window_bounds = array<i64: 1, 32>}, {pipeline_mode = #tpu.pipeline_mode<synchronous>, transform_indices = @transform_3, window_bounds = array<i64: 32, 32>}, {pipeline_mode = #tpu.pipeline_mode<synchronous>, transform_indices = @transform_4, window_bounds = array<i64: 1, 32>}, {pipeline_mode = #tpu.pipeline_mode<synchronous>, transform_indices = @transform_5, window_bounds = array<i64: 32, 32>}, {pipeline_mode = #tpu.pipeline_mode<synchronous>, transform_indices = @transform_6, window_bounds = array<i64: 1, 32>}, {pipeline_mode = #tpu.pipeline_mode<synchronous>, transform_indices = @transform_7, window_bounds = array<i64: 32, 4>}, {pipeline_mode = #tpu.pipeline_mode<synchronous>, transform_indices = @transform_8, window_bounds = array<i64: 1, 4>}, {transform_indices = @transform_9, window_bounds = array<i64: 8, 4>}]} {
    %c0 = arith.constant 0 : index
    %c0_0 = arith.constant 0 : index
    %0 = vector.load %arg1[%c0, %c0_0] : memref<8x16xf32, #tpu.memory_space<vmem>>, vector<8x16xf32>
    %c0_1 = arith.constant 0 : index
    %c0_2 = arith.constant 0 : index
    %1 = vector.load %arg2[%c0_1, %c0_2] : memref<16x32xf32, #tpu.memory_space<vmem>>, vector<16x32xf32>
    %cst = arith.constant dense<0.000000e+00> : vector<8x32xf32>
    %2 = tpu.matmul %0, %1, %cst {dimension_numbers = #tpu.dot_dimension_numbers<[1], [0], [0], [1], [0, 0, 1, 1], [], []>} : vector<8x16xf32>, vector<16x32xf32>, vector<8x32xf32> -> vector<8x32xf32>
    %c0_3 = arith.constant 0 : index
    %c0_4 = arith.constant 0 : index
    %3 = vector.load %arg3[%c0_3, %c0_4] : memref<1x32xf32, #tpu.memory_space<vmem>>, vector<1x32xf32>
    %4 = vector.broadcast %3 : vector<1x32xf32> to vector<8x32xf32>
    %5 = arith.addf %2, %4 : vector<8x32xf32>
    %cst_5 = arith.constant 0.000000e+00 : f32
    %6 = vector.broadcast %cst_5 : f32 to vector<8x32xf32>
    %7 = arith.maximumf %5, %6 : vector<8x32xf32>
    %c0_6 = arith.constant 0 : index
    %c0_7 = arith.constant 0 : index
    %8 = vector.load %arg4[%c0_6, %c0_7] : memref<32x32xf32, #tpu.memory_space<vmem>>, vector<32x32xf32>
    %cst_8 = arith.constant dense<0.000000e+00> : vector<8x32xf32>
    %9 = tpu.matmul %7, %8, %cst_8 {dimension_numbers = #tpu.dot_dimension_numbers<[1], [0], [0], [1], [0, 0, 1, 1], [], []>} : vector<8x32xf32>, vector<32x32xf32>, vector<8x32xf32> -> vector<8x32xf32>
    %c0_9 = arith.constant 0 : index
    %c0_10 = arith.constant 0 : index
    %10 = vector.load %arg5[%c0_9, %c0_10] : memref<1x32xf32, #tpu.memory_space<vmem>>, vector<1x32xf32>
    %11 = vector.broadcast %10 : vector<1x32xf32> to vector<8x32xf32>
    %12 = arith.addf %9, %11 : vector<8x32xf32>
    %cst_11 = arith.constant 0.000000e+00 : f32
    %13 = vector.broadcast %cst_11 : f32 to vector<8x32xf32>
    %14 = arith.maximumf %12, %13 : vector<8x32xf32>
    %c0_12 = arith.constant 0 : index
    %c0_13 = arith.constant 0 : index
    %15 = vector.load %arg6[%c0_12, %c0_13] : memref<32x32xf32, #tpu.memory_space<vmem>>, vector<32x32xf32>
    %cst_14 = arith.constant dense<0.000000e+00> : vector<8x32xf32>
    %16 = tpu.matmul %14, %15, %cst_14 {dimension_numbers = #tpu.dot_dimension_numbers<[1], [0], [0], [1], [0, 0, 1, 1], [], []>} : vector<8x32xf32>, vector<32x32xf32>, vector<8x32xf32> -> vector<8x32xf32>
    %c0_15 = arith.constant 0 : index
    %c0_16 = arith.constant 0 : index
    %17 = vector.load %arg7[%c0_15, %c0_16] : memref<1x32xf32, #tpu.memory_space<vmem>>, vector<1x32xf32>
    %18 = vector.broadcast %17 : vector<1x32xf32> to vector<8x32xf32>
    %19 = arith.addf %16, %18 : vector<8x32xf32>
    %cst_17 = arith.constant 0.000000e+00 : f32
    %20 = vector.broadcast %cst_17 : f32 to vector<8x32xf32>
    %21 = arith.maximumf %19, %20 : vector<8x32xf32>
    %c0_18 = arith.constant 0 : index
    %c0_19 = arith.constant 0 : index
    %22 = vector.load %arg8[%c0_18, %c0_19] : memref<32x4xf32, #tpu.memory_space<vmem>>, vector<32x4xf32>
    %cst_20 = arith.constant dense<0.000000e+00> : vector<8x4xf32>
    %23 = tpu.matmul %21, %22, %cst_20 {dimension_numbers = #tpu.dot_dimension_numbers<[1], [0], [0], [1], [0, 0, 1, 1], [], []>} : vector<8x32xf32>, vector<32x4xf32>, vector<8x4xf32> -> vector<8x4xf32>
    %c0_21 = arith.constant 0 : index
    %c0_22 = arith.constant 0 : index
    %24 = vector.load %arg9[%c0_21, %c0_22] : memref<1x4xf32, #tpu.memory_space<vmem>>, vector<1x4xf32>
    %25 = vector.broadcast %24 : vector<1x4xf32> to vector<8x4xf32>
    %26 = arith.addf %23, %25 : vector<8x4xf32>
    %c0_23 = arith.constant 0 : index
    %c0_24 = arith.constant 0 : index
    %27 = vector.load %arg10[%c0_23, %c0_24] : memref<8x4xf32, #tpu.memory_space<vmem>>, vector<8x4xf32>
    tpu.vector_store %arg10[%c0_23, %c0_24], %26 {strides = array<i32>} : memref<8x4xf32, #tpu.memory_space<vmem>>, vector<8x4xf32>,
    return
  }
  func.func @transform_0(%arg0: i32) -> (i32, i32) {
    %c0_i32 = arith.constant 0 : i32
    %c0_i32_0 = arith.constant 0 : i32
    return %arg0, %c0_i32 : i32, i32
  }
  func.func @transform_1(%arg0: i32) -> (i32, i32) {
    %c0_i32 = arith.constant 0 : i32
    %c0_i32_0 = arith.constant 0 : i32
    %c0_i32_1 = arith.constant 0 : i32
    return %c0_i32, %c0_i32_0 : i32, i32
  }
  func.func @transform_2(%arg0: i32) -> (i32, i32) {
    %c0_i32 = arith.constant 0 : i32
    %c0_i32_0 = arith.constant 0 : i32
    %c0_i32_1 = arith.constant 0 : i32
    return %c0_i32, %c0_i32_0 : i32, i32
  }
  func.func @transform_3(%arg0: i32) -> (i32, i32) {
    %c0_i32 = arith.constant 0 : i32
    %c0_i32_0 = arith.constant 0 : i32
    %c0_i32_1 = arith.constant 0 : i32
    return %c0_i32, %c0_i32_0 : i32, i32
  }
  func.func @transform_4(%arg0: i32) -> (i32, i32) {
    %c0_i32 = arith.constant 0 : i32
    %c0_i32_0 = arith.constant 0 : i32
    %c0_i32_1 = arith.constant 0 : i32
    return %c0_i32, %c0_i32_0 : i32, i32
  }
  func.func @transform_5(%arg0: i32) -> (i32, i32) {
    %c0_i32 = arith.constant 0 : i32
    %c0_i32_0 = arith.constant 0 : i32
    %c0_i32_1 = arith.constant 0 : i32
    return %c0_i32, %c0_i32_0 : i32, i32
  }
  func.func @transform_6(%arg0: i32) -> (i32, i32) {
    %c0_i32 = arith.constant 0 : i32
    %c0_i32_0 = arith.constant 0 : i32
    %c0_i32_1 = arith.constant 0 : i32
    return %c0_i32, %c0_i32_0 : i32, i32
  }
  func.func @transform_7(%arg0: i32) -> (i32, i32) {
    %c0_i32 = arith.constant 0 : i32
    %c0_i32_0 = arith.constant 0 : i32
    %c0_i32_1 = arith.constant 0 : i32
    return %c0_i32, %c0_i32_0 : i32, i32
  }
  func.func @transform_8(%arg0: i32) -> (i32, i32) {
    %c0_i32 = arith.constant 0 : i32
    %c0_i32_0 = arith.constant 0 : i32
    %c0_i32_1 = arith.constant 0 : i32
    return %c0_i32, %c0_i32_0 : i32, i32
  }
  func.func @transform_9(%arg0: i32) -> (i32, i32) {
    %c0_i32 = arith.constant 0 : i32
    %c0_i32_0 = arith.constant 0 : i32
    return %arg0, %c0_i32 : i32, i32
  }
}

</mosaic_0001>

<bundles_post_ra>
// kernel: tpu_custom_call.1
= control target key start
LH: loop header
LB: loop body
LE: loop exit
PB: predicated region body
PF: predicated region fallthrough
CT: control target
= control target key end

     0   :  { %14 = vsyncpa [#allocation3], 0  ;;  %s668_s0 = inlined_call_operand.vmem [shape: f32[8,16], index: 0, kind: input, shape index: {}]   ;;  %s669_s1 = inlined_call_operand.hbm [shape: f32[16,32], index: 1, kind: input, shape index: {}]   ;;  %s670_s2 = inlined_call_operand.vmem [shape: f32[1,32], index: 2, kind: input, shape index: {}]   ;;  %s671_s3 = inlined_call_operand.vmem [shape: f32[32,32], index: 3, kind: input, shape index: {}]   ;;  %s672_s4 = inlined_call_operand.hbm [shape: f32[1,32], index: 4, kind: input, shape index: {}]   ;;  %s673_s5 = inlined_call_operand.hbm [shape: f32[32,32], index: 5, kind: input, shape index: {}]   ;;  %s674_s6 = inlined_call_operand.vmem [shape: f32[1,32], index: 6, kind: input, shape index: {}]   ;;  %s675_s7 = inlined_call_operand.vmem [shape: f32[32,4], index: 7, kind: input, shape index: {}]   ;;  %s676_s8 = inlined_call_operand.vmem [shape: f32[1,4], index: 8, kind: input, shape index: {}]   ;;  %s677_s9 = inlined_call_operand.vmem [shape: f32[8,4], index: 9, kind: output, shape index: {}]  }
   0x1   :  { %15 = vsyncpa [#allocation5], 0  ;;  %s556_s30 = smov [#allocation4]   ;;  %s557_s11 = smov [#allocation2]  }
   0x2   :  { %s40_s10 = sshll.u32 %s556_s30, 4  ;;  %s23_s12 = sshll.u32 %s557_s11, 4  ;;  %s41_s10 = int_to_ptr.vmem [resolvable:$true] %s40_s10  ;;  %s24_s12 = int_to_ptr.vmem [resolvable:$true] %s23_s12 }
   0x3   :  { %s500_s13 = scalar_lea.vmem %s41_s10, 16  ;;  %s504_s14 = scalar_lea.vmem %s41_s10, 32 }
   0x4   :  { %p501_p0 = scmp.ne.s32.totalorder %s41_s10, %s500_s13  ;;  %p505_p1 = scmp.lt.s32.totalorder %s41_s10, %s41_s10 }
   0x5   :  { %p506_p2 = scmp.lt.s32.totalorder %s504_s14, %s500_s13 }
   0x7   :  { %p507_p3 = por %p506_p2, %p505_p1 }
   0x9   :  { %p508_p4 = pnand %p507_p3, %p501_p0 }
   0xb   :  { %511 = shalt.err (!%p508_p4)
}
   0xc   :  { %43 = dma.hbm_to_vmem [thread:$0]  %s672_s4, 16, %s41_s10, [#allocation5]  }
   0xd   :  { %s520_s17 = scalar_lea.vmem %s24_s12, 256  ;;  %p525_p6 = scmp.lt.s32.totalorder %s24_s12, %s24_s12 }
   0xe   :  { %p521_p5 = scmp.ne.s32.totalorder %s24_s12, %s520_s17  ;;  %p526_p7 = scmp.lt.s32.totalorder %s520_s17, %s520_s17 }
  0x10   :  { %p527_p8 = por %p526_p7, %p525_p6 }
  0x12   :  { %p528_p9 = pnand %p527_p8, %p521_p5 }
  0x14   :  { %531 = shalt.err (!%p528_p9)
}
  0x15   :  { %s558_s18 = smov 128   ;;  %s559_s19 = smov 8  }
  0x16   :  { %29 = dma.hbm_to_vmem [thread:$0]  %s669_s1, 256, %s24_s12, [#allocation3], %s558_s18, %s558_s18, %s559_s19  }
  0x17   :  { %s560_s22 = smov [#allocation6]  }
  0x18   :  { %s49_s23 = sshll.u32 %s560_s22, 4  ;;  %s50_s23 = int_to_ptr.vmem [resolvable:$true] %s49_s23 }
  0x19   :  { %s540_s24 = scalar_lea.vmem %s50_s23, 512  ;;  %p545_p11 = scmp.lt.s32.totalorder %s50_s23, %s50_s23 }
  0x1a   :  { %p541_p10 = scmp.ne.s32.totalorder %s50_s23, %s540_s24  ;;  %p546_p12 = scmp.lt.s32.totalorder %s540_s24, %s540_s24 }
  0x1c   :  { %p547_p13 = por %p546_p12, %p545_p11 }
  0x1e   :  { %p548_p0 = pnand %p547_p13, %p541_p10 }
  0x20   :  { %551 = shalt.err (!%p548_p0)
}
  0x21   :  { %55 = dma.hbm_to_vmem [thread:$0]  %s673_s5, 512, %s50_s23, [#allocation5], %s558_s18, %s558_s18, %s559_s19  }
  0x22   :  { %552 = dma.done.wait [#allocation3], 256  }
  0x23   :  { %553 = vsyncadd [#allocation3], 4294967040 }
  0x24   :  { %554 = dma.done.wait [#allocation5], 528  }
  0x25   :  { %555 = vsyncadd [#allocation5], 4294966768  ;;  %v561_v0 = vmov 0.0   ;;  %vm562_vm0 = vmmov 0   ;;  %v73_v1 = vld [vmem:[#allocation2 + $0x8] sm:$0xff]  ;;  %v72_v2 = vld [vmem:[#allocation2] sm:$0xff] }
  0x26   :  { %445 = vmatprep.subr.mxu0 %v561_v0  ;;  %449 = vmatprep.mubr.msk.f32.mxu0 %vm562_vm0, %v561_v0  ;;  %v71_v3 = vld [vmem:[%s668_s0] sm:$0xff]  ;;  %vm81_vm1 = vcmask 130048   ;;  %v159_v4 = vld [vmem:[%s671_s3 + $0x18] sm:$0xff]  ;;  %v158_v5 = vld [vmem:[%s671_s3 + $0x10] sm:$0xff]  ;;  %vm167_vm2 = vcmask 261120   ;;  %vm411_vm3 = vcmask 31744  }
  0x27   :  { %452 = vmatprep.subr.mxu1 %v561_v0  ;;  %460 = vmatprep.mubr.msk.f32.mxu1 %vm562_vm0, %v561_v0  ;;  %v157_v6 = vld [vmem:[%s671_s3 + $0x8] sm:$0xff]  ;;  %v156_v7 = vld [vmem:[%s671_s3] sm:$0xff]  ;;  %v242_v16 = vld [vmem:[#allocation6] sm:$0xff] }
  0x28   :  { %446 = vmatpush3.msra.mxu0 %v73_v1  ;;  %453 = vmatpush3.msra.mxu1 %v159_v4  ;;  %v245_v8 = vld [vmem:[#allocation6 + $0x18] sm:$0xff]  ;;  %v419_v9 = vld [vmem:[%s670_s2] ss:$0 sm:$0xff]  ;;  %v244_v14 = vld [vmem:[#allocation6 + $0x10] sm:$0xff] }
  0x29   :  { %447 = vmatprep.subr.mxu0 %v561_v0  ;;  %454 = vmatprep.subr.mxu1 %v561_v0  ;;  %v243_v15 = vld [vmem:[#allocation6 + $0x8] sm:$0xff]  ;;  %v421_v18 = vld [vmem:[#allocation4] ss:$0 sm:$0xff]  ;;  %v328_v24 = vld [vmem:[%s675_s7 + $0x8] sm:$0xff] }
  0x2a   :  { %448 = vmatpush3.msra.mxu0 %v72_v2  ;;  %455 = vmatpush3.msra.mxu1 %v158_v5  ;;  %v330_v17 = vld [vmem:[%s675_s7 + $0x18] sm:$0xff]  ;;  %v329_v23 = vld [vmem:[%s675_s7 + $0x10] sm:$0xff]  ;;  %v327_v25 = vld [vmem:[%s675_s7] sm:$0xff] }
  0x2b   :  { %450 = vmatmul.mubr.msk.f32.vlgmr.msra.gmra.mxu0 %vm81_vm1, %v71_v3  ;;  %463 = vmatprep.subr.mxu0 %v561_v0  ;;  %v423_v26 = vld [vmem:[%s674_s6] ss:$0 sm:$0xff] }
  0x2c   :  { %471 = vmatprep.mubr.msk.f32.mxu0 %vm562_vm0, %v561_v0  ;;  %456 = vmatprep.subr.mxu1 %v561_v0  ;;  %v425_v31 = vld [vmem:[%s676_s8] ss:$0 sm:$0xff] }
  0x2d   :  { %457 = vmatpush3.msra.mxu1 %v157_v6  ;;  %464 = vmatpush3.msra.mxu0 %v245_v8 }
  0x2e   :  { %458 = vmatprep.subr.mxu1 %v561_v0  ;;  %465 = vmatprep.subr.mxu0 %v561_v0 }
  0x2f   :  { %459 = vmatpush3.msra.mxu1 %v156_v7  ;;  %466 = vmatpush3.msra.mxu0 %v244_v14 }
  0x30   :  { %474 = vmatprep.subr.mxu1 %v561_v0  ;;  %467 = vmatprep.subr.mxu0 %v561_v0 }
  0x31   :  { %468 = vmatpush3.msra.mxu0 %v243_v15 }
  0x32   :  { %469 = vmatprep.subr.mxu0 %v561_v0 }
  0x33   :  { %470 = vmatpush3.msra.mxu0 %v242_v16 }
  0xeb   :  { %v151_v10 = vpop.f32.mrf.mxu0 }
  0xec   :  { %v152_v11 = vadd.f32 %v419_v9, %v151_v10 }
  0xed   :  { %v451_v12 = vpop.f32.mrf.mxu0 }
  0xee   :  { %v155_v13 = vmax.f32 %v152_v11, 0.0 }
  0xf0   :  { %461 = vmatmul.mubr.msk.f32.vlgmr.msra.gmra.mxu1 %vm167_vm2, %v155_v13 }
  0xf1   :  { %482 = vmatprep.mubr.msk.f32.mxu1 %vm562_vm0, %v561_v0  ;;  %475 = vmatpush3.msra.mxu1 %v330_v17 }
  0xf2   :  { %476 = vmatprep.subr.mxu1 %v561_v0 }
  0xf3   :  { %477 = vmatpush3.msra.mxu1 %v329_v23 }
  0xf4   :  { %478 = vmatprep.subr.mxu1 %v561_v0 }
  0xf5   :  { %479 = vmatpush3.msra.mxu1 %v328_v24 }
  0xf6   :  { %480 = vmatprep.subr.mxu1 %v561_v0 }
  0xf7   :  { %481 = vmatpush3.msra.mxu1 %v327_v25 }
 0x1b0   :  { %v237_v19 = vpop.f32.mrf.mxu1 }
 0x1b1   :  { %v238_v20 = vadd.f32 %v421_v18, %v237_v19 }
 0x1b2   :  { %v462_v21 = vpop.f32.mrf.mxu1 }
 0x1b3   :  { %v241_v22 = vmax.f32 %v238_v20, 0.0 }
 0x1b5   :  { %472 = vmatmul.mubr.msk.f32.vlgmr.msra.gmra.mxu0 %vm167_vm2, %v241_v22 }
 0x275   :  { %v322_v27 = vpop.f32.mrf.mxu0 }
 0x276   :  { %v323_v28 = vadd.f32 %v423_v26, %v322_v27 }
 0x277   :  { %v473_v29 = vpop.f32.mrf.mxu0 }
 0x278   :  { %v326_v30 = vmax.f32 %v323_v28, 0.0 }
 0x27a   :  { %483 = vmatmul.mubr.msk.f32.vlgmr.msra.gmra.mxu1 %vm167_vm2, %v326_v30 }
 0x33a   :  { %v407_v32 = vpop.f32.mrf.mxu1 }
 0x33b   :  { %v408_v33 = vadd.f32 %v425_v31, %v407_v32 }
 0x33c   :  { %v484_v34 = vpop.f32.mrf.mxu1 }
 0x33d   :  { %412 = vst.msk [vmem:[%s677_s9] sm:$0xff] %vm411_vm3, %v408_v33 }
 0x33e   :  { %417 = vsyncpa [#allocation3], 1 }
 0x33f   :  { %418 = vsyncpa [#allocation5], 1 }

</bundles_post_ra>
